<compile_context>
chip_gen: v7x
topology: tpu7x:2x2x1
jax: 0.10.0
libtpu: 0.0.40
codegen_flags: <defaults>
</compile_context>

<pallas_src>
import functools

import jax
import jax.numpy as jnp
from jax.experimental import pallas as pl
from jax.experimental.pallas import tpu as pltpu  # noqa: F401 (TPU backend)

LANE = 128


# ---------------------------------------------------------------------------
# Fused Pallas kernel: whole forward pass in one call
# ---------------------------------------------------------------------------
def _fused_cnn_kernel(a_ref, z_ref, w_ref, b_ref, o_ref, *, num_layers, d):
    """Runs the full graph-conv stack + final linear + sigmoid in VMEM.

    a_ref : (N, N)        row-normalized p2p adjacency
    z_ref : (N, 2*d)      [forc | h], each branch padded to d lanes
    w_ref : (2L+1, d, d)  packed weights  [wf_0, wh_0, ..., wf_{L-1}, wh_{L-1}, w_out]
    b_ref : (2L+1, d)     packed biases   (same order)
    o_ref : (N, d)        sigmoid(h @ w_out + b_out), lane-dense (slice outside)
    """
    a = a_ref[...]                                   # (N, N)
    z = z_ref[...]                                   # (N, 2d) = [forc | h]

    for l in range(num_layers):                      # static unroll (L is tiny)
        # Single MXU pass of A against the concatenated forc/h block.
        az = jnp.dot(a, z, preferred_element_type=jnp.float32)      # (N, 2d)
        wf = w_ref[2 * l]                                            # (d, d)
        wh = w_ref[2 * l + 1]                                        # (d, d)
        bf = b_ref[2 * l: 2 * l + 1, :]                              # (1, d)
        bh = b_ref[2 * l + 1: 2 * l + 2, :]                          # (1, d)
        f = jnp.dot(az[:, :d], wf, preferred_element_type=jnp.float32) + bf
        h = jnp.dot(az[:, d:], wh, preferred_element_type=jnp.float32) + bh
        f = jnp.maximum(f, 0.0)                      # ReLU (dropout=0 → identity)
        h = jnp.maximum(h, 0.0)
        z = jnp.concatenate([f, h], axis=-1)         # lane-aligned (128-boundary)

    # Final nn.Linear on h, then sigmoid.  Padded columns of w_out/b_out are
    # zero → padded output lanes are sigmoid(0)=0.5, sliced off by the wrapper.
    h = z[:, d:]
    y = jnp.dot(h, w_ref[2 * num_layers],
                preferred_element_type=jnp.float32) + b_ref[2 * num_layers:
                                                            2 * num_layers + 1, :]
    o_ref[...] = (1.0 / (1.0 + jnp.exp(-y))).astype(o_ref.dtype)   # exp → EUP


# ---------------------------------------------------------------------------
# Parameter init (deterministic, mimics torch.nn.Linear U(-1/sqrt(fan_in), ..))
# Weights/biases are zero-padded to 128 lanes and packed into single arrays.
# ---------------------------------------------------------------------------
def _pad_w(w, d):
    return jnp.pad(w, ((0, d - w.shape[0]), (0, d - w.shape[1])))


def _pad_b(b, d):
    return jnp.pad(b, (0, d - b.shape[0]))


def init_params(key, in_feats, h_feats, num_classes):
    dims = [in_feats] + list(h_feats)
    num_layers = len(h_feats)
    d_raw = max(in_feats, max(h_feats), num_classes)
    d = ((d_raw + LANE - 1) // LANE) * LANE          # pad feature dims to 128

    ws, bs = [], []
    for i in range(num_layers):
        din, dout = dims[i], dims[i + 1]
        key, kfw, kfb, khw, khb = jax.random.split(key, 5)
        lim = 1.0 / float(din) ** 0.5
        wf = jax.random.uniform(kfw, (din, dout), jnp.float32, -lim, lim)
        bf = jax.random.uniform(kfb, (dout,), jnp.float32, -lim, lim)
        wh = jax.random.uniform(khw, (din, dout), jnp.float32, -lim, lim)
        bh = jax.random.uniform(khb, (dout,), jnp.float32, -lim, lim)
        ws += [_pad_w(wf, d), _pad_w(wh, d)]
        bs += [_pad_b(bf, d), _pad_b(bh, d)]

    key, kow, kob = jax.random.split(key, 3)
    lim = 1.0 / float(h_feats[-1]) ** 0.5
    wo = jax.random.uniform(kow, (h_feats[-1], num_classes), jnp.float32, -lim, lim)
    bo = jax.random.uniform(kob, (num_classes,), jnp.float32, -lim, lim)
    ws.append(_pad_w(wo, d))
    bs.append(_pad_b(bo, d))

    return dict(W=jnp.stack(ws),            # (2L+1, d, d)
                B=jnp.stack(bs),            # (2L+1, d)
                num_layers=num_layers, d=d, num_classes=num_classes)


# ---------------------------------------------------------------------------
# CNN.forward equivalent — ONE fused pallas_call for the whole forward pass
# ---------------------------------------------------------------------------
def cnn_forward(params, p2p, F_, X, dropout=0.0):
    # TODO(synk): F.dropout with p>0 (training-time) not implemented; module is
    # instantiated with dropout=0 so it is the identity here.
    del dropout
    n = p2p.shape[0]
    d = params["d"]
    num_layers = params["num_layers"]
    num_classes = params["num_classes"]

    # Zero-pad both branches to d lanes and concatenate: z0 = [forc | h].
    zf = jnp.pad(F_.astype(jnp.float32), ((0, 0), (0, d - F_.shape[1])))
    zh = jnp.pad(X.astype(jnp.float32), ((0, 0), (0, d - X.shape[1])))
    z0 = jnp.concatenate([zf, zh], axis=-1)          # (N, 2d)

    kernel = functools.partial(_fused_cnn_kernel, num_layers=num_layers, d=d)
    out_padded = pl.pallas_call(
        kernel,
        out_shape=jax.ShapeDtypeStruct((n, d), jnp.float32),
        # No grid: whole problem is a few KB — single invocation, all inputs
        # resident in VMEM, no inter-layer HBM round-trips.
    )(p2p.astype(jnp.float32), z0, params["W"], params["B"])

    return out_padded[:, :num_classes]


if __name__ == "__main__":
    # Small shapes consistent with the module:
    #   N = 8 graph nodes, in_feats = 16, h_feats = [32, 32], num_classes = 4
    N, in_feats = 8, 16
    h_feats = [32, 32]
    num_classes = 4

    key = jax.random.PRNGKey(0)
    key, kF, kX, kA, kP = jax.random.split(key, 5)

    F_ = jax.random.normal(kF, (N, in_feats), jnp.float32)
    X = jax.random.normal(kX, (N, in_feats), jnp.float32)
    # symmetric row-normalized p2p adjacency with self-loops
    adj = (jax.random.uniform(kA, (N, N)) > 0.5).astype(jnp.float32)
    adj = jnp.maximum(adj, adj.T) + jnp.eye(N, dtype=jnp.float32)
    p2p = adj / jnp.sum(adj, axis=1, keepdims=True)

    params = init_params(kP, in_feats, h_feats, num_classes)

    out = cnn_forward(params, p2p, F_, X, dropout=0.0)
    out = jax.block_until_ready(out)
    assert out.shape == (N, num_classes)
    assert bool(jnp.all(jnp.isfinite(out)))
    assert bool(jnp.all((out >= 0.0) & (out <= 1.0)))
    print("KERNEL_OK")
</pallas_src>

<mosaic_0001>
module attributes {stable_mosaic.version = 11 : i64} {
  func.func @_fused_cnn_kernel(%arg0: memref<8x8xf32, #tpu.memory_space<vmem>>, %arg1: memref<8x256xf32, #tpu.memory_space<vmem>>, %arg2: memref<5x128x128xf32, #tpu.memory_space<vmem>>, %arg3: memref<5x128xf32, #tpu.memory_space<vmem>>, %arg4: memref<8x128xf32, #tpu.memory_space<vmem>>) attributes {dimension_semantics = [], scalar_prefetch = 0 : i64, scratch_operands = 0 : i64, tpu.core_type = #tpu.core_type<tc>} {
    %c0 = arith.constant 0 : index
    %c0_0 = arith.constant 0 : index
    %0 = vector.load %arg0[%c0, %c0_0] : memref<8x8xf32, #tpu.memory_space<vmem>>, vector<8x8xf32>
    %c0_1 = arith.constant 0 : index
    %c0_2 = arith.constant 0 : index
    %1 = vector.load %arg1[%c0_1, %c0_2] : memref<8x256xf32, #tpu.memory_space<vmem>>, vector<8x256xf32>
    %cst = arith.constant dense<0.000000e+00> : vector<8x256xf32>
    %2 = tpu.matmul %0, %1, %cst {dimension_numbers = #tpu.dot_dimension_numbers<[1], [0], [0], [1], [0, 0, 1, 1], [], []>} : vector<8x8xf32>, vector<8x256xf32>, vector<8x256xf32> -> vector<8x256xf32>
    %c0_3 = arith.constant 0 : index
    %c0_4 = arith.constant 0 : index
    %c0_5 = arith.constant 0 : index
    %3 = vector.load %arg2[%c0_3, %c0_4, %c0_5] : memref<5x128x128xf32, #tpu.memory_space<vmem>>, vector<1x128x128xf32>
    %4 = vector.shape_cast %3 : vector<1x128x128xf32> to vector<128x128xf32>
    %c1 = arith.constant 1 : index
    %c0_6 = arith.constant 0 : index
    %c0_7 = arith.constant 0 : index
    %5 = vector.load %arg2[%c1, %c0_6, %c0_7] : memref<5x128x128xf32, #tpu.memory_space<vmem>>, vector<1x128x128xf32>
    %6 = vector.shape_cast %5 : vector<1x128x128xf32> to vector<128x128xf32>
    %c0_8 = arith.constant 0 : index
    %c0_9 = arith.constant 0 : index
    %7 = vector.load %arg3[%c0_8, %c0_9] : memref<5x128xf32, #tpu.memory_space<vmem>>, vector<1x128xf32>
    %c1_10 = arith.constant 1 : index
    %c0_11 = arith.constant 0 : index
    %8 = vector.load %arg3[%c1_10, %c0_11] : memref<5x128xf32, #tpu.memory_space<vmem>>, vector<1x128xf32>
    %9 = vector.extract_strided_slice %2 {offsets = [0, 0], sizes = [8, 128], strides = [1, 1]} : vector<8x256xf32> to vector<8x128xf32>
    %cst_12 = arith.constant dense<0.000000e+00> : vector<8x128xf32>
    %10 = tpu.matmul %9, %4, %cst_12 {dimension_numbers = #tpu.dot_dimension_numbers<[1], [0], [0], [1], [0, 0, 1, 1], [], []>} : vector<8x128xf32>, vector<128x128xf32>, vector<8x128xf32> -> vector<8x128xf32>
    %11 = vector.broadcast %7 : vector<1x128xf32> to vector<8x128xf32>
    %12 = arith.addf %10, %11 : vector<8x128xf32>
    %13 = vector.extract_strided_slice %2 {offsets = [0, 128], sizes = [8, 128], strides = [1, 1]} : vector<8x256xf32> to vector<8x128xf32>
    %cst_13 = arith.constant dense<0.000000e+00> : vector<8x128xf32>
    %14 = tpu.matmul %13, %6, %cst_13 {dimension_numbers = #tpu.dot_dimension_numbers<[1], [0], [0], [1], [0, 0, 1, 1], [], []>} : vector<8x128xf32>, vector<128x128xf32>, vector<8x128xf32> -> vector<8x128xf32>
    %15 = vector.broadcast %8 : vector<1x128xf32> to vector<8x128xf32>
    %16 = arith.addf %14, %15 : vector<8x128xf32>
    %cst_14 = arith.constant 0.000000e+00 : f32
    %17 = vector.broadcast %cst_14 : f32 to vector<8x128xf32>
    %18 = arith.maximumf %12, %17 : vector<8x128xf32>
    %cst_15 = arith.constant 0.000000e+00 : f32
    %19 = vector.broadcast %cst_15 : f32 to vector<8x128xf32>
    %20 = arith.maximumf %16, %19 : vector<8x128xf32>
    %21 = tpu.concatenate %18, %20 in 1 : vector<8x128xf32>, vector<8x128xf32> -> vector<8x256xf32>
    %cst_16 = arith.constant dense<0.000000e+00> : vector<8x256xf32>
    %22 = tpu.matmul %0, %21, %cst_16 {dimension_numbers = #tpu.dot_dimension_numbers<[1], [0], [0], [1], [0, 0, 1, 1], [], []>} : vector<8x8xf32>, vector<8x256xf32>, vector<8x256xf32> -> vector<8x256xf32>
    %c2 = arith.constant 2 : index
    %c0_17 = arith.constant 0 : index
    %c0_18 = arith.constant 0 : index
    %23 = vector.load %arg2[%c2, %c0_17, %c0_18] : memref<5x128x128xf32, #tpu.memory_space<vmem>>, vector<1x128x128xf32>
    %24 = vector.shape_cast %23 : vector<1x128x128xf32> to vector<128x128xf32>
    %c3 = arith.constant 3 : index
    %c0_19 = arith.constant 0 : index
    %c0_20 = arith.constant 0 : index
    %25 = vector.load %arg2[%c3, %c0_19, %c0_20] : memref<5x128x128xf32, #tpu.memory_space<vmem>>, vector<1x128x128xf32>
    %26 = vector.shape_cast %25 : vector<1x128x128xf32> to vector<128x128xf32>
    %c2_21 = arith.constant 2 : index
    %c0_22 = arith.constant 0 : index
    %27 = vector.load %arg3[%c2_21, %c0_22] : memref<5x128xf32, #tpu.memory_space<vmem>>, vector<1x128xf32>
    %c3_23 = arith.constant 3 : index
    %c0_24 = arith.constant 0 : index
    %28 = vector.load %arg3[%c3_23, %c0_24] : memref<5x128xf32, #tpu.memory_space<vmem>>, vector<1x128xf32>
    %29 = vector.extract_strided_slice %22 {offsets = [0, 0], sizes = [8, 128], strides = [1, 1]} : vector<8x256xf32> to vector<8x128xf32>
    %cst_25 = arith.constant dense<0.000000e+00> : vector<8x128xf32>
    %30 = tpu.matmul %29, %24, %cst_25 {dimension_numbers = #tpu.dot_dimension_numbers<[1], [0], [0], [1], [0, 0, 1, 1], [], []>} : vector<8x128xf32>, vector<128x128xf32>, vector<8x128xf32> -> vector<8x128xf32>
    %31 = vector.broadcast %27 : vector<1x128xf32> to vector<8x128xf32>
    %32 = arith.addf %30, %31 : vector<8x128xf32>
    %33 = vector.extract_strided_slice %22 {offsets = [0, 128], sizes = [8, 128], strides = [1, 1]} : vector<8x256xf32> to vector<8x128xf32>
    %cst_26 = arith.constant dense<0.000000e+00> : vector<8x128xf32>
    %34 = tpu.matmul %33, %26, %cst_26 {dimension_numbers = #tpu.dot_dimension_numbers<[1], [0], [0], [1], [0, 0, 1, 1], [], []>} : vector<8x128xf32>, vector<128x128xf32>, vector<8x128xf32> -> vector<8x128xf32>
    %35 = vector.broadcast %28 : vector<1x128xf32> to vector<8x128xf32>
    %36 = arith.addf %34, %35 : vector<8x128xf32>
    %cst_27 = arith.constant 0.000000e+00 : f32
    %37 = vector.broadcast %cst_27 : f32 to vector<8x128xf32>
    %38 = arith.maximumf %32, %37 : vector<8x128xf32>
    %cst_28 = arith.constant 0.000000e+00 : f32
    %39 = vector.broadcast %cst_28 : f32 to vector<8x128xf32>
    %40 = arith.maximumf %36, %39 : vector<8x128xf32>
    %41 = tpu.concatenate %38, %40 in 1 : vector<8x128xf32>, vector<8x128xf32> -> vector<8x256xf32>
    %42 = vector.extract_strided_slice %41 {offsets = [0, 128], sizes = [8, 128], strides = [1, 1]} : vector<8x256xf32> to vector<8x128xf32>
    %c4 = arith.constant 4 : index
    %c0_29 = arith.constant 0 : index
    %c0_30 = arith.constant 0 : index
    %43 = vector.load %arg2[%c4, %c0_29, %c0_30] : memref<5x128x128xf32, #tpu.memory_space<vmem>>, vector<1x128x128xf32>
    %44 = vector.shape_cast %43 : vector<1x128x128xf32> to vector<128x128xf32>
    %cst_31 = arith.constant dense<0.000000e+00> : vector<8x128xf32>
    %45 = tpu.matmul %42, %44, %cst_31 {dimension_numbers = #tpu.dot_dimension_numbers<[1], [0], [0], [1], [0, 0, 1, 1], [], []>} : vector<8x128xf32>, vector<128x128xf32>, vector<8x128xf32> -> vector<8x128xf32>
    %c4_32 = arith.constant 4 : index
    %c0_33 = arith.constant 0 : index
    %46 = vector.load %arg3[%c4_32, %c0_33] : memref<5x128xf32, #tpu.memory_space<vmem>>, vector<1x128xf32>
    %47 = vector.broadcast %46 : vector<1x128xf32> to vector<8x128xf32>
    %48 = arith.addf %45, %47 : vector<8x128xf32>
    %cst_34 = arith.constant 0.000000e+00 : f32
    %49 = vector.broadcast %cst_34 : f32 to vector<8x128xf32>
    %50 = arith.subf %49, %48 : vector<8x128xf32>
    %51 = math.exp %50 : vector<8x128xf32>
    %cst_35 = arith.constant 1.000000e+00 : f32
    %52 = vector.broadcast %cst_35 : f32 to vector<8x128xf32>
    %53 = arith.addf %52, %51 : vector<8x128xf32>
    %cst_36 = arith.constant 1.000000e+00 : f32
    %54 = vector.broadcast %cst_36 : f32 to vector<8x128xf32>
    %55 = arith.divf %54, %53 : vector<8x128xf32>
    %c0_37 = arith.constant 0 : index
    %c0_38 = arith.constant 0 : index
    %56 = vector.load %arg4[%c0_37, %c0_38] : memref<8x128xf32, #tpu.memory_space<vmem>>, vector<8x128xf32>
    tpu.vector_store %arg4[%c0_37, %c0_38], %55 {strides = array<i32>} : memref<8x128xf32, #tpu.memory_space<vmem>>, vector<8x128xf32>,
    return
  }
}

</mosaic_0001>

<bundles_post_ra>
// kernel: tpu_custom_call.1
= control target key start
LH: loop header
LB: loop body
LE: loop exit
PB: predicated region body
PF: predicated region fallthrough
CT: control target
= control target key end

     0   :  { %9 = vsyncpa [#allocation3], 0  ;;  %s1155_s0 = inlined_call_operand.hbm [shape: f32[8,8], index: 0, kind: input, shape index: {}]   ;;  %s1156_s1 = inlined_call_operand.hbm [shape: f32[8,256], index: 1, kind: input, shape index: {}]   ;;  %s1157_s2 = inlined_call_operand.hbm [shape: f32[5,128,128], index: 2, kind: input, shape index: {}]   ;;  %s1158_s3 = inlined_call_operand.vmem [shape: f32[5,128], index: 3, kind: input, shape index: {}]   ;;  %s1159_s4 = inlined_call_operand.hbm [shape: f32[8,128], index: 4, kind: output, shape index: {}]  }
   0x1   :  { %10 = vsyncpa [#allocation6], 0 }
   0x2   :  { %11 = vsyncpa [#allocation4], 0  ;;  %s1013_s15 = smov [#allocation5]   ;;  %s1014_s17 = smov [#allocation2]  }
   0x3   :  { %s28_s16 = sshll.u32 %s1013_s15, 4  ;;  %s18_s18 = sshll.u32 %s1014_s17, 4  ;;  %s29_s16 = int_to_ptr.vmem [resolvable:$true] %s28_s16  ;;  %s19_s18 = int_to_ptr.vmem [resolvable:$true] %s18_s18 }
   0x4   :  { %s919_s21 = scalar_lea.hbm %s1156_s1, 256 }
   0x5   :  { %p920_p0 = scmp.ne.s32.totalorder %s1156_s1, %s919_s21  ;;  %p923_p1 = scmp.lt.u32.totalorder %s919_s21, %s1156_s1 }
   0x7   :  { %p925_p2 = pnand %p923_p1, %p920_p0 }
   0x9   :  { %928 = shalt.err (!%p925_p2)
}
   0xa   :  { %s929_s26 = scalar_lea.vmem %s29_s16, 256  ;;  %p934_p4 = scmp.lt.s32.totalorder %s29_s16, %s29_s16 }
   0xb   :  { %p930_p3 = scmp.ne.s32.totalorder %s29_s16, %s929_s26  ;;  %p935_p5 = scmp.lt.s32.totalorder %s929_s26, %s929_s26 }
   0xd   :  { %p936_p6 = por %p935_p5, %p934_p4 }
   0xf   :  { %p937_p7 = pnand %p936_p6, %p930_p3 }
  0x11   :  { %940 = shalt.err (!%p937_p7)
}
  0x12   :  { %31 = dma.hbm_to_vmem [thread:$0]  %s1156_s1, 256, %s29_s16, [#allocation6]  }
  0x13   :  { %s941_s5 = scalar_lea.hbm %s1155_s0, 128 }
  0x14   :  { %p942_p8 = scmp.ne.s32.totalorder %s1155_s0, %s941_s5  ;;  %p945_p9 = scmp.lt.u32.totalorder %s941_s5, %s1155_s0 }
  0x16   :  { %p947_p10 = pnand %p945_p9, %p942_p8 }
  0x18   :  { %950 = shalt.err (!%p947_p10)
}
  0x19   :  { %s951_s10 = scalar_lea.vmem %s19_s18, 128  ;;  %p956_p12 = scmp.lt.s32.totalorder %s19_s18, %s19_s18 }
  0x1a   :  { %p952_p11 = scmp.ne.s32.totalorder %s19_s18, %s951_s10  ;;  %p957_p13 = scmp.lt.s32.totalorder %s951_s10, %s951_s10 }
  0x1c   :  { %p958_p0 = por %p957_p13, %p956_p12 }
  0x1e   :  { %p959_p1 = pnand %p958_p0, %p952_p11 }
  0x20   :  { %962 = shalt.err (!%p959_p1)
}
  0x21   :  { %21 = dma.hbm_to_vmem [thread:$0]  %s1155_s0, 128, %s19_s18, [#allocation3]  }
  0x22   :  { %s1015_s12 = smov [#allocation7]   ;;  %s963_s16 = scalar_lea.hbm %s1157_s2, 10240 }
  0x23   :  { %s37_s13 = sshll.u32 %s1015_s12, 4  ;;  %p964_p2 = scmp.ne.s32.totalorder %s1157_s2, %s963_s16  ;;  %s38_s13 = int_to_ptr.vmem [resolvable:$true] %s37_s13 }
  0x24   :  { %p967_p3 = scmp.lt.u32.totalorder %s963_s16, %s1157_s2 }
  0x26   :  { %p969_p4 = pnand %p967_p3, %p964_p2 }
  0x28   :  { %972 = shalt.err (!%p969_p4)
}
  0x29   :  { %s973_s22 = scalar_lea.vmem %s38_s13, 10240  ;;  %p978_p6 = scmp.lt.s32.totalorder %s38_s13, %s38_s13 }
  0x2a   :  { %p974_p5 = scmp.ne.s32.totalorder %s38_s13, %s973_s22  ;;  %p979_p7 = scmp.lt.s32.totalorder %s973_s22, %s973_s22 }
  0x2c   :  { %p980_p8 = por %p979_p7, %p978_p6 }
  0x2e   :  { %p981_p9 = pnand %p980_p8, %p974_p5 }
  0x30   :  { %984 = shalt.err (!%p981_p9)
}
  0x31   :  { %s1016_s0 = smov 128   ;;  %s1017_s18 = smov 8  }
  0x32   :  { %43 = dma.hbm_to_vmem [thread:$0]  %s1157_s2, 10240, %s38_s13, [#allocation6], %s1016_s0, %s1016_s0, %s1017_s18  }
  0x33   :  { %1007 = dma.done.wait [#allocation3], 128  }
  0x34   :  { %1008 = vsyncadd [#allocation3], 4294967168 }
  0x35   :  { %1009 = dma.done.wait [#allocation6], 10496  }
  0x36   :  { %1010 = vsyncadd [#allocation6], 4294956800  ;;  %v1018_v0 = vmov 0.0   ;;  %v1019_v1 = vmov 0.0|0.0   ;;  %v57_v2 = vld [vmem:[#allocation5 + $0x8] sm:$0xff]  ;;  %v56_v3 = vld [vmem:[#allocation5] sm:$0xff] }
  0x37   :  { %126 = vmatprep.mubr.f32.mxu0 %v1018_v0  ;;  %810 = vmatprep.subr.bf16.mxu1 %v1019_v1  ;;  %v1085_v4 = vld [vmem:[#allocation2] sm:$0xff]  ;;  %vm58_vm0 = vcmask 64512   ;;  %v133_v5 = vld [vmem:[#allocation7] sm:$0xff]  ;;  %v135_v10 = vld [vmem:[#allocation7 + $0x10] sm:$0xff]  ;;  %vm1020_vm1 = vmmov 0   ;;  %s1021_s6 = smov [#allocation8]  }
  0x38   :  { %62 = vmatprep.subr.mxu0 %v57_v2  ;;  %v134_v6 = vld [vmem:[#allocation7 + $0x8] sm:$0xff]  ;;  %v150_v7 = vld [vmem:[#allocation7 + $0x80] sm:$0xff]  ;;  %v136_v11 = vld [vmem:[#allocation7 + $0x18] sm:$0xff]  ;;  %702 = vmatprep.mubr.msk.f32.mxu1 %vm1020_vm1, %v1018_v0  ;;  %s586_s7 = sshll.u32 %s1021_s6, 4  ;;  %s587_s7 = int_to_ptr.vmem [resolvable:$true] %s586_s7 }
  0x39   :  { %63 = vmatpush1.msra.mxu0 %v56_v3  ;;  %v811_v8 = vpack.c.bf16 %v134_v6, %v133_v5  ;;  %v151_v9 = vld [vmem:[#allocation7 + $0x88] sm:$0xff]  ;;  %v152_v13 = vld [vmem:[#allocation7 + $0x90] sm:$0xff]  ;;  %v153_v14 = vld [vmem:[#allocation7 + $0x98] sm:$0xff]  ;;  %v814_v15 = vpack.c.bf16 %v136_v11, %v135_v10  ;;  %s985_s8 = scalar_lea.vmem %s587_s7, 128  ;;  %p990_p11 = scmp.lt.s32.totalorder %s587_s7, %s587_s7 }
  0x3a   :  { %596 = vmatmul.mubr.msk.f32.vlgmr.msra.gmra.mrb[0].mxu0 %vm58_vm0, %v1085_v4  ;;  %834 = vmatprep.subr.bf16.mxu0 %v1019_v1  ;;  %v835_v12 = vpack.c.bf16 %v151_v9, %v150_v7  ;;  %v838_v16 = vpack.c.bf16 %v153_v14, %v152_v13  ;;  %v137_v17 = vld [vmem:[#allocation7 + $0x20] sm:$0xff]  ;;  %v138_v18 = vld [vmem:[#allocation7 + $0x28] sm:$0xff]  ;;  %v139_v23 = vld [vmem:[#allocation7 + $0x30] sm:$0xff]  ;;  %p986_p10 = scmp.ne.s32.totalorder %s587_s7, %s985_s8  ;;  %p991_p12 = scmp.lt.s32.totalorder %s985_s8, %s985_s8 }
  0x3b   :  { %812 = vmatpush3.bf16.msra.mxu1 %v811_v8  ;;  %v154_v19 = vld [vmem:[#allocation7 + $0xa0] sm:$0xff]  ;;  %v155_v20 = vld [vmem:[#allocation7 + $0xa8] sm:$0xff]  ;;  %v817_v21 = vpack.c.bf16 %v138_v18, %v137_v17  ;;  %v140_v24 = vld [vmem:[#allocation7 + $0x38] sm:$0xff]  ;;  %737 = vmatprep.mubr.msk.f32.mxu0 %vm1020_vm1, %v1018_v0 }
  0x3c   :  { %836 = vmatpush3.bf16.msra.mxu0 %v835_v12  ;;  %813 = vmatprep.subr.bf16.mxu1 %v1019_v1  ;;  %v841_v22 = vpack.c.bf16 %v155_v20, %v154_v19  ;;  %v156_v25 = vld [vmem:[#allocation7 + $0xb0] sm:$0xff]  ;;  %v157_v26 = vld [vmem:[#allocation7 + $0xb8] sm:$0xff]  ;;  %v820_v27 = vpack.c.bf16 %v140_v24, %v139_v23  ;;  %v141_v29 = vld [vmem:[#allocation7 + $0x40] sm:$0xff]  ;;  %p992_p13 = por %p991_p12, %p990_p11 }
  0x3d   :  { %837 = vmatprep.subr.bf16.mxu0 %v1019_v1  ;;  %v844_v28 = vpack.c.bf16 %v157_v26, %v156_v25  ;;  %v142_v30 = vld [vmem:[#allocation7 + $0x48] sm:$0xff]  ;;  %v158_v31 = vld [vmem:[#allocation7 + $0xc0] sm:$0xff]  ;;  %v143_v35 = vld [vmem:[#allocation7 + $0x50] sm:$0xff] }
  0x3e   :  { %v159_v32 = vld [vmem:[#allocation7 + $0xc8] sm:$0xff]  ;;  %v823_v33 = vpack.c.bf16 %v142_v30, %v141_v29  ;;  %v144_v36 = vld [vmem:[#allocation7 + $0x58] sm:$0xff]  ;;  %v160_v37 = vld [vmem:[#allocation7 + $0xd0] sm:$0xff]  ;;  %p993_p0 = pnand %p992_p13, %p986_p10 }
  0x3f   :  { %815 = vmatpush3.bf16.msra.mxu1 %v814_v15  ;;  %v847_v34 = vpack.c.bf16 %v159_v32, %v158_v31  ;;  %v161_v38 = vld [vmem:[#allocation7 + $0xd8] sm:$0xff]  ;;  %v826_v39 = vpack.c.bf16 %v144_v36, %v143_v35  ;;  %v145_v41 = vld [vmem:[#allocation7 + $0x60] sm:$0xff]  ;;  %v146_v42 = vld [vmem:[#allocation7 + $0x68] sm:$0xff] }
  0x40   :  { %839 = vmatpush3.bf16.msra.mxu0 %v838_v16  ;;  %816 = vmatprep.subr.bf16.mxu1 %v1019_v1  ;;  %v850_v40 = vpack.c.bf16 %v161_v38, %v160_v37  ;;  %v162_v43 = vld [vmem:[#allocation7 + $0xe0] sm:$0xff]  ;;  %v163_v44 = vld [vmem:[#allocation7 + $0xe8] sm:$0xff]  ;;  %v829_v45 = vpack.c.bf16 %v146_v42, %v145_v41  ;;  %v147_v47 = vld [vmem:[#allocation7 + $0x70] sm:$0xff] }
  0x41   :  { %840 = vmatprep.subr.bf16.mxu0 %v1019_v1  ;;  %v853_v46 = vpack.c.bf16 %v163_v44, %v162_v43  ;;  %v148_v48 = vld [vmem:[#allocation7 + $0x78] sm:$0xff]  ;;  %v164_v49 = vld [vmem:[#allocation7 + $0xf0] sm:$0xff]  ;;  %v389_v55 = vld [vmem:[#allocation7 + $0x180] sm:$0xff] }
  0x42   :  { %v165_v50 = vld [vmem:[#allocation7 + $0xf8] sm:$0xff]  ;;  %v832_v51 = vpack.c.bf16 %v148_v48, %v147_v47  ;;  %v390_v56 = vld [vmem:[#allocation7 + $0x188] sm:$0xff]  ;;  %v391_v57 = vld [vmem:[#allocation7 + $0x190] sm:$0xff] }
  0x43   :  { %818 = vmatpush3.bf16.msra.mxu1 %v817_v21  ;;  %v856_v52 = vpack.c.bf16 %v165_v50, %v164_v49  ;;  %v859_v58 = vpack.c.bf16 %v390_v56, %v389_v55  ;;  %v392_v59 = vld [vmem:[#allocation7 + $0x198] sm:$0xff]  ;;  %v393_v61 = vld [vmem:[#allocation7 + $0x1a0] sm:$0xff]  ;;  %v394_v62 = vld [vmem:[#allocation7 + $0x1a8] sm:$0xff] }
  0x44   :  { %842 = vmatpush3.bf16.msra.mxu0 %v841_v22  ;;  %819 = vmatprep.subr.bf16.mxu1 %v1019_v1  ;;  %v862_v60 = vpack.c.bf16 %v392_v59, %v391_v57  ;;  %v865_v63 = vpack.c.bf16 %v394_v62, %v393_v61  ;;  %v395_v2 = vld [vmem:[#allocation7 + $0x1b0] sm:$0xff]  ;;  %v396_v3 = vld [vmem:[#allocation7 + $0x1b8] sm:$0xff]  ;;  %v397_v6 = vld [vmem:[#allocation7 + $0x1c0] sm:$0xff] }
  0x45   :  { %843 = vmatprep.subr.bf16.mxu0 %v1019_v1  ;;  %v868_v5 = vpack.c.bf16 %v396_v3, %v395_v2  ;;  %v398_v7 = vld [vmem:[#allocation7 + $0x1c8] sm:$0xff]  ;;  %v399_v9 = vld [vmem:[#allocation7 + $0x1d0] sm:$0xff]  ;;  %v400_v10 = vld [vmem:[#allocation7 + $0x1d8] sm:$0xff] }
  0x46   :  { %v871_v8 = vpack.c.bf16 %v398_v7, %v397_v6  ;;  %v874_v11 = vpack.c.bf16 %v400_v10, %v399_v9  ;;  %v401_v12 = vld [vmem:[#allocation7 + $0x1e0] sm:$0xff]  ;;  %v402_v13 = vld [vmem:[#allocation7 + $0x1e8] sm:$0xff]  ;;  %v403_v15 = vld [vmem:[#allocation7 + $0x1f0] sm:$0xff] }
  0x47   :  { %821 = vmatpush3.bf16.msra.mxu1 %v820_v27  ;;  %v877_v14 = vpack.c.bf16 %v402_v13, %v401_v12  ;;  %v404_v16 = vld [vmem:[#allocation7 + $0x1f8] sm:$0xff]  ;;  %v597_v18 = vld [vmem:[%s1158_s3] ss:$0 sm:$0xff]  ;;  %v598_v19 = vld [vmem:[%s1158_s3 + $0x1] ss:$0 sm:$0xff] }
  0x48   :  { %845 = vmatpush3.bf16.msra.mxu0 %v844_v28  ;;  %822 = vmatprep.subr.bf16.mxu1 %v1019_v1  ;;  %v880_v17 = vpack.c.bf16 %v404_v16, %v403_v15  ;;  %v482_v28 = vld [vmem:[#allocation7 + $0x200] sm:$0xff]  ;;  %v483_v29 = vld [vmem:[#allocation7 + $0x208] sm:$0xff]  ;;  %v484_v30 = vld [vmem:[#allocation7 + $0x210] sm:$0xff] }
  0x49   :  { %846 = vmatprep.subr.bf16.mxu0 %v1019_v1  ;;  %v883_v31 = vpack.c.bf16 %v483_v29, %v482_v28  ;;  %v485_v32 = vld [vmem:[#allocation7 + $0x218] sm:$0xff]  ;;  %v487_v35 = vld [vmem:[#allocation7 + $0x228] sm:$0xff]  ;;  %v492_v41 = vld [vmem:[#allocation7 + $0x250] sm:$0xff] }
  0x4a   :  { %v489_v37 = vld [vmem:[#allocation7 + $0x238] sm:$0xff]  ;;  %v494_v44 = vld [vmem:[#allocation7 + $0x260] sm:$0xff]  ;;  %v496_v49 = vld [vmem:[#allocation7 + $0x270] sm:$0xff] }
  0x4b   :  { %824 = vmatpush3.bf16.msra.mxu1 %v823_v33  ;;  %v886_v33 = vpack.c.bf16 %v485_v32, %v484_v30  ;;  %v493_v42 = vld [vmem:[#allocation7 + $0x258] sm:$0xff] }
  0x4c   :  { %848 = vmatpush3.bf16.msra.mxu0 %v847_v34  ;;  %825 = vmatprep.subr.bf16.mxu1 %v1019_v1  ;;  %v486_v34 = vld [vmem:[#allocation7 + $0x220] sm:$0xff]  ;;  %v898_v43 = vpack.c.bf16 %v493_v42, %v492_v41  ;;  %v497_v50 = vld [vmem:[#allocation7 + $0x278] sm:$0xff] }
  0x4d   :  { %849 = vmatprep.subr.bf16.mxu0 %v1019_v1  ;;  %v889_v36 = vpack.c.bf16 %v487_v35, %v486_v34 }
  0x4f   :  { %827 = vmatpush3.bf16.msra.mxu1 %v826_v39  ;;  %v491_v39 = vld [vmem:[#allocation7 + $0x248] sm:$0xff] }
  0x50   :  { %851 = vmatpush3.bf16.msra.mxu0 %v850_v40  ;;  %828 = vmatprep.subr.bf16.mxu1 %v1019_v1 }
  0x51   :  { %852 = vmatprep.subr.bf16.mxu0 %v1019_v1 }
  0x53   :  { %830 = vmatpush3.bf16.msra.mxu1 %v829_v45  ;;  %v495_v45 = vld [vmem:[#allocation7 + $0x268] sm:$0xff] }
  0x54   :  { %854 = vmatpush3.bf16.msra.mxu0 %v853_v46  ;;  %831 = vmatprep.subr.bf16.mxu1 %v1019_v1  ;;  %v901_v46 = vpack.c.bf16 %v495_v45, %v494_v44 }
  0x55   :  { %855 = vmatprep.subr.bf16.mxu0 %v1019_v1 }
  0x57   :  { %833 = vmatpush3.bf16.msra.mxu1 %v832_v51  ;;  %v904_v51 = vpack.c.bf16 %v497_v50, %v496_v49 }
  0x58   :  { %857 = vmatpush3.bf16.msra.mxu0 %v856_v52  ;;  %v600_v52 = vld [vmem:[%s1158_s3 + $0x3] ss:$0 sm:$0xff] }
  0x59   :  { %858 = vmatprep.subr.bf16.mxu0 %v1019_v1 }
 0x10d   :  { %v128_v53 = vpop.f32.mrb[0].mxu0 }
 0x10e   :  { %v130_v54 = vpop.f32.mrb[1].mxu0  ;;  %703 = vmatmul.mubr.f32.vlgmr.msra.gmra.mrb[0].mxu1 %v128_v53 }
 0x10f   :  { %738 = vmatmul.mubr.f32.vlgmr.msra.gmra.mrb[2].mxu0 %v130_v54  ;;  %382 = vmatprep.mubr.f32.mxu1 %v1018_v0 }
 0x110   :  { %772 = vmatprep.mubr.msk.f32.mxu0 %vm1020_vm1, %v1018_v0  ;;  %860 = vmatpush3.bf16.msra.mxu0 %v859_v58 }
 0x111   :  { %861 = vmatprep.subr.bf16.mxu0 %v1019_v1 }
 0x114   :  { %863 = vmatpush3.bf16.msra.mxu0 %v862_v60 }
 0x115   :  { %864 = vmatprep.subr.bf16.mxu0 %v1019_v1 }
 0x118   :  { %866 = vmatpush3.bf16.msra.mxu0 %v865_v63 }
 0x119   :  { %867 = vmatprep.subr.bf16.mxu0 %v1019_v1 }
 0x11c   :  { %869 = vmatpush3.bf16.msra.mxu0 %v868_v5 }
 0x11d   :  { %870 = vmatprep.subr.bf16.mxu0 %v1019_v1 }
 0x120   :  { %872 = vmatpush3.bf16.msra.mxu0 %v871_v8 }
 0x121   :  { %873 = vmatprep.subr.bf16.mxu0 %v1019_v1 }
 0x124   :  { %875 = vmatpush3.bf16.msra.mxu0 %v874_v11 }
 0x125   :  { %876 = vmatprep.subr.bf16.mxu0 %v1019_v1 }
 0x128   :  { %878 = vmatpush3.bf16.msra.mxu0 %v877_v14 }
 0x129   :  { %879 = vmatprep.subr.bf16.mxu0 %v1019_v1 }
 0x12c   :  { %881 = vmatpush3.bf16.msra.mxu0 %v880_v17 }
 0x1e1   :  { %v238_v20 = vpop.f32.mrb[0].mxu1 }
 0x1e2   :  { %v239_v21 = vadd.f32 %v597_v18, %v238_v20  ;;  %v704_v22 = vpop.f32.mrb[1].mxu1  ;;  %v312_v23 = vpop.f32.mrb[2].mxu0 }
 0x1e3   :  { %v313_v24 = vadd.f32 %v598_v19, %v312_v23  ;;  %v739_v25 = vpop.f32.mrb[3].mxu0 }
 0x1e4   :  { %v316_v27 = vmax.f32 %v239_v21, 0.0 }
 0x1e5   :  { %v317_v26 = vmax.f32 %v313_v24, 0.0 }
 0x1e7   :  { %318 = vmatprep.subr.mxu1 %v317_v26 }
 0x1e8   :  { %319 = vmatpush1.msra.mxu1 %v316_v27 }
 0x1e9   :  { %599 = vmatmul.mubr.msk.f32.vlgmr.msra.gmra.mrb[2].mxu1 %vm58_vm0, %v1085_v4  ;;  %882 = vmatprep.subr.bf16.mxu1 %v1019_v1  ;;  %v488_v4 = vld [vmem:[#allocation7 + $0x230] sm:$0xff] }
 0x1ea   :  { %807 = vmatprep.mubr.msk.f32.mxu1 %vm1020_vm1, %v1018_v0  ;;  %884 = vmatpush3.bf16.msra.mxu1 %v883_v31  ;;  %v892_v38 = vpack.c.bf16 %v489_v37, %v488_v4  ;;  %v490_v0 = vld [vmem:[#allocation7 + $0x240] sm:$0xff] }
 0x1eb   :  { %885 = vmatprep.subr.bf16.mxu1 %v1019_v1  ;;  %v895_v40 = vpack.c.bf16 %v491_v39, %v490_v0 }
 0x1ee   :  { %887 = vmatpush3.bf16.msra.mxu1 %v886_v33 }
 0x1ef   :  { %888 = vmatprep.subr.bf16.mxu1 %v1019_v1 }
 0x1f2   :  { %890 = vmatpush3.bf16.msra.mxu1 %v889_v36 }
 0x1f3   :  { %891 = vmatprep.subr.bf16.mxu1 %v1019_v1 }
 0x1f6   :  { %893 = vmatpush3.bf16.msra.mxu1 %v892_v38 }
 0x1f7   :  { %894 = vmatprep.subr.bf16.mxu1 %v1019_v1 }
 0x1fa   :  { %896 = vmatpush3.bf16.msra.mxu1 %v895_v40 }
 0x1fb   :  { %897 = vmatprep.subr.bf16.mxu1 %v1019_v1 }
 0x1fe   :  { %899 = vmatpush3.bf16.msra.mxu1 %v898_v43 }
 0x1ff   :  { %900 = vmatprep.subr.bf16.mxu1 %v1019_v1 }
 0x202   :  { %902 = vmatpush3.bf16.msra.mxu1 %v901_v46 }
 0x203   :  { %903 = vmatprep.subr.bf16.mxu1 %v1019_v1  ;;  %v601_v1 = vld [vmem:[%s1158_s3 + $0x4] ss:$0 sm:$0xff] }
 0x206   :  { %905 = vmatpush3.bf16.msra.mxu1 %v904_v51 }
 0x2bc   :  { %v384_v47 = vpop.f32.mrb[2].mxu1 }
 0x2bd   :  { %v385_v48 = vpop.f32.mrb[3].mxu1 }
 0x2be   :  { %773 = vmatmul.mubr.f32.vlgmr.msra.gmra.mrb[4].mxu0 %v385_v48 }
 0x391   :  { %v476_v53 = vpop.f32.mrb[4].mxu0 }
 0x392   :  { %v477_v54 = vadd.f32 %v600_v52, %v476_v53  ;;  %v774_v55 = vpop.f32.mrb[5].mxu0 }
 0x394   :  { %v480_v56 = vmax.f32 %v477_v54, 0.0 }
 0x396   :  { %808 = vmatmul.mubr.f32.vlgmr.msra.gmra.mrb[4].mxu1 %v480_v56 }
 0x469   :  { %v569_v57 = vpop.f32.mrb[4].mxu1 }
 0x46a   :  { %v570_v58 = vadd.f32 %v601_v1, %v569_v57  ;;  %v809_v59 = vpop.f32.mrb[5].mxu1 }
 0x46c   :  { %v573_v60 = vsub.f32 0.0, %v570_v58 }
 0x46e   :  { %v574_v61 = vmul.f32 1.442695, %v573_v60 }
 0x470   :  { %915 = vpow2.f32 %v574_v61 }
 0x47a   :  { %v916_v62 = vpop.eup %915 }
 0x47b   :  { %v576_v63 = vadd.f32 1.0, %v916_v62 }
 0x47d   :  { %917 = vrcp.f32 %v576_v63 }
 0x487   :  { %v918_v2 = vpop.eup %917 }
 0x488   :  { %579 = vst [vmem:[#allocation8] sm:$0xff] %v918_v2 }
 0x489   :  { %996 = shalt.err (!%p993_p0)
}
 0x48a   :  { %s997_s10 = scalar_lea.hbm %s1159_s4, 128 }
 0x48b   :  { %p998_p1 = scmp.ne.s32.totalorder %s1159_s4, %s997_s10  ;;  %p1001_p2 = scmp.lt.u32.totalorder %s997_s10, %s1159_s4 }
 0x48d   :  { %p1003_p3 = pnand %p1001_p2, %p998_p1 }
 0x48f   :  { %1006 = shalt.err (!%p1003_p3)
}
 0x490   :  { %589 = dma.vmem_to_hbm [thread:$0]  %s587_s7, 128, %s1159_s4, [#allocation4]  }
 0x491   :  { %1011 = dma.done.wait [#allocation4], 128  }
 0x492   :  { %1012 = vsyncadd [#allocation4], 4294967168 }
 0x493   :  { %593 = vsyncpa [#allocation3], 1 }
 0x494   :  { %594 = vsyncpa [#allocation6], 1 }
 0x495   :  { %595 = vsyncpa [#allocation4], 1 }

</bundles_post_ra>
